<compile_context>
chip_gen: v7x
topology: tpu7x:2x2x1
jax: 0.10.0
libtpu: 0.0.40
codegen_flags: <defaults>
</compile_context>

<pallas_src>
import jax
import jax.numpy as jnp
from jax.experimental import pallas as pl
from jax.experimental.pallas import tpu as pltpu


def _maxmin_kernel(x_ref, vmin_ref, vmax_ref, o_ref):
    x = x_ref[...]            # (B, TN)
    vmin = vmin_ref[...]      # (1, TN) -> broadcasts over the B sublanes
    vmax = vmax_ref[...]      # (1, TN)
    # softplus(z) = log1p(exp(z)) (numerically stable, matches F.softplus).
    lv = vmax - jax.nn.softplus(vmax - x)
    lv = vmin + jax.nn.softplus(lv - vmin)
    o_ref[...] = lv


def _pick_tile(n, target, lane=128):
    """Largest multiple-of-`lane` divisor of n that is <= target (None if n % lane)."""
    if n % lane != 0:
        return None
    t = min(n, max(target, lane))
    t -= t % lane
    while t >= lane:
        if n % t == 0:
            return t
        t -= lane
    return lane  # unreachable: n % lane == 0 guarantees lane divides n


def maxmin_variance_forward(x, min_logvar, max_logvar):
    """x: (B, C, H, W); min/max_logvar: (1, C, H, W). Returns (logvar, min, max)."""
    B, C, H, W = x.shape
    assert min_logvar.shape == (1, C, H, W)
    assert max_logvar.shape == (1, C, H, W)
    N = C * H * W
    elem_bytes = jnp.dtype(x.dtype).itemsize

    # Lane-dense flattening (layout plumbing only; undone on the output).
    x2 = x.reshape(B, N)
    vmin2 = min_logvar.reshape(1, N)
    vmax2 = max_logvar.reshape(1, N)

    # Aim for ~1 MiB per x/out tile; params add only tn*elem_bytes each.
    target_tn = max(128, (1 << 20) // max(1, B * elem_bytes))
    tn = _pick_tile(N, target_tn)
    if tn is None:
        # Fallback: N not a multiple of 128 -> single full-extent block
        # (legal because block dims equal the full array dims).
        tn = N
    grid = (N // tn,)

    out2 = pl.pallas_call(
        _maxmin_kernel,
        out_shape=jax.ShapeDtypeStruct((B, N), x.dtype),
        grid_spec=pl.GridSpec(
            grid=grid,
            in_specs=[
                pl.BlockSpec((B, tn), lambda j: (0, j)),   # x tile (full batch, lane-dense)
                pl.BlockSpec((1, tn), lambda j: (0, j)),   # min_logvar tile (broadcast over B)
                pl.BlockSpec((1, tn), lambda j: (0, j)),   # max_logvar tile (broadcast over B)
            ],
            out_specs=pl.BlockSpec((B, tn), lambda j: (0, j)),
        ),
        compiler_params=pltpu.CompilerParams(
            dimension_semantics=("parallel",),
        ),
    )(x2, vmin2, vmax2)

    # Module returns (clamped_logvar, min_logvar, max_logvar)
    return out2.reshape(B, C, H, W), min_logvar, max_logvar


def _reference(x, vmin, vmax):
    lv = vmax - jax.nn.softplus(vmax - x)
    lv = vmin + jax.nn.softplus(lv - vmin)
    return lv


if __name__ == "__main__":
    # Small shapes consistent with the module: dim = (1, C, H, W)
    B, C, H, W = 2, 4, 16, 16
    key = jax.random.PRNGKey(0)
    x = jax.random.normal(key, (B, C, H, W), dtype=jnp.float32) * 3.0

    # Deterministic parameter init exactly as in __init__:
    max_logvar = jnp.full((1, C, H, W), 2.0, dtype=jnp.float32)
    min_logvar = jnp.full((1, C, H, W), -10.0, dtype=jnp.float32)

    out, vmin_out, vmax_out = maxmin_variance_forward(x, min_logvar, max_logvar)
    out = jax.block_until_ready(out)

    # Correctness check against pure-JAX reference.
    ref = _reference(x, min_logvar, max_logvar)
    assert jnp.allclose(out, ref, atol=1e-5, rtol=1e-5), "mismatch vs reference"
    assert vmin_out.shape == (1, C, H, W) and vmax_out.shape == (1, C, H, W)

    print("KERNEL_OK")
</pallas_src>

<mosaic_0001>
module attributes {stable_mosaic.version = 11 : i64} {
  func.func @_maxmin_kernel(%arg0: i32, %arg1: memref<2x1024xf32, #tpu.memory_space<vmem>>, %arg2: memref<1x1024xf32, #tpu.memory_space<vmem>>, %arg3: memref<1x1024xf32, #tpu.memory_space<vmem>>, %arg4: memref<2x1024xf32, #tpu.memory_space<vmem>>) attributes {dimension_semantics = [#tpu.dimension_semantics<parallel>], iteration_bounds = array<i64: 1>, scalar_prefetch = 0 : i64, scratch_operands = 0 : i64, tpu.core_type = #tpu.core_type<tc>, window_params = [{transform_indices = @transform_0, window_bounds = array<i64: 2, 1024>}, {transform_indices = @transform_1, window_bounds = array<i64: 1, 1024>}, {transform_indices = @transform_2, window_bounds = array<i64: 1, 1024>}, {transform_indices = @transform_3, window_bounds = array<i64: 2, 1024>}]} {
    %c0 = arith.constant 0 : index
    %c0_0 = arith.constant 0 : index
    %0 = vector.load %arg1[%c0, %c0_0] : memref<2x1024xf32, #tpu.memory_space<vmem>>, vector<2x1024xf32>
    %c0_1 = arith.constant 0 : index
    %c0_2 = arith.constant 0 : index
    %1 = vector.load %arg2[%c0_1, %c0_2] : memref<1x1024xf32, #tpu.memory_space<vmem>>, vector<1x1024xf32>
    %c0_3 = arith.constant 0 : index
    %c0_4 = arith.constant 0 : index
    %2 = vector.load %arg3[%c0_3, %c0_4] : memref<1x1024xf32, #tpu.memory_space<vmem>>, vector<1x1024xf32>
    %3 = vector.broadcast %2 : vector<1x1024xf32> to vector<2x1024xf32>
    %4 = arith.subf %3, %0 : vector<2x1024xf32>
    %cst = arith.constant 0.000000e+00 : f32
    %5 = vector.broadcast %cst : f32 to vector<2x1024xf32>
    %6 = arith.maximumf %4, %5 : vector<2x1024xf32>
    %7 = vector.broadcast %cst : f32 to vector<2x1024xf32>
    %8 = arith.subf %4, %7 : vector<2x1024xf32>
    %9 = arith.cmpf one, %8, %8 : vector<2x1024xf32>
    %10 = vector.broadcast %cst : f32 to vector<2x1024xf32>
    %11 = arith.addf %4, %10 : vector<2x1024xf32>
    %12 = math.absf %8 : vector<2x1024xf32>
    %cst_5 = arith.constant 0.000000e+00 : f32
    %13 = vector.broadcast %cst_5 : f32 to vector<2x1024xf32>
    %14 = arith.subf %13, %12 : vector<2x1024xf32>
    %15 = math.exp %14 : vector<2x1024xf32>
    %16 = math.log1p %15 : vector<2x1024xf32>
    %17 = arith.addf %6, %16 : vector<2x1024xf32>
    %18 = arith.select %9, %11, %17 : vector<2x1024xi1>, vector<2x1024xf32>
    %19 = vector.broadcast %2 : vector<1x1024xf32> to vector<2x1024xf32>
    %20 = arith.subf %19, %18 : vector<2x1024xf32>
    %21 = vector.broadcast %1 : vector<1x1024xf32> to vector<2x1024xf32>
    %22 = arith.subf %20, %21 : vector<2x1024xf32>
    %cst_6 = arith.constant 0.000000e+00 : f32
    %23 = vector.broadcast %cst_6 : f32 to vector<2x1024xf32>
    %24 = arith.maximumf %22, %23 : vector<2x1024xf32>
    %25 = vector.broadcast %cst_6 : f32 to vector<2x1024xf32>
    %26 = arith.subf %22, %25 : vector<2x1024xf32>
    %27 = arith.cmpf one, %26, %26 : vector<2x1024xf32>
    %28 = vector.broadcast %cst_6 : f32 to vector<2x1024xf32>
    %29 = arith.addf %22, %28 : vector<2x1024xf32>
    %30 = math.absf %26 : vector<2x1024xf32>
    %cst_7 = arith.constant 0.000000e+00 : f32
    %31 = vector.broadcast %cst_7 : f32 to vector<2x1024xf32>
    %32 = arith.subf %31, %30 : vector<2x1024xf32>
    %33 = math.exp %32 : vector<2x1024xf32>
    %34 = math.log1p %33 : vector<2x1024xf32>
    %35 = arith.addf %24, %34 : vector<2x1024xf32>
    %36 = arith.select %27, %29, %35 : vector<2x1024xi1>, vector<2x1024xf32>
    %37 = vector.broadcast %1 : vector<1x1024xf32> to vector<2x1024xf32>
    %38 = arith.addf %37, %36 : vector<2x1024xf32>
    %c0_8 = arith.constant 0 : index
    %c0_9 = arith.constant 0 : index
    %39 = vector.load %arg4[%c0_8, %c0_9] : memref<2x1024xf32, #tpu.memory_space<vmem>>, vector<2x1024xf32>
    tpu.vector_store %arg4[%c0_8, %c0_9], %38 {strides = array<i32>} : memref<2x1024xf32, #tpu.memory_space<vmem>>, vector<2x1024xf32>,
    return
  }
  func.func @transform_0(%arg0: i32) -> (i32, i32) {
    %c0_i32 = arith.constant 0 : i32
    %c0_i32_0 = arith.constant 0 : i32
    return %c0_i32, %arg0 : i32, i32
  }
  func.func @transform_1(%arg0: i32) -> (i32, i32) {
    %c0_i32 = arith.constant 0 : i32
    %c0_i32_0 = arith.constant 0 : i32
    return %c0_i32, %arg0 : i32, i32
  }
  func.func @transform_2(%arg0: i32) -> (i32, i32) {
    %c0_i32 = arith.constant 0 : i32
    %c0_i32_0 = arith.constant 0 : i32
    return %c0_i32, %arg0 : i32, i32
  }
  func.func @transform_3(%arg0: i32) -> (i32, i32) {
    %c0_i32 = arith.constant 0 : i32
    %c0_i32_0 = arith.constant 0 : i32
    return %c0_i32, %arg0 : i32, i32
  }
}

</mosaic_0001>

<bundles_post_ra>
// kernel: tpu_custom_call.1
= control target key start
LH: loop header
LB: loop body
LE: loop exit
PB: predicated region body
PF: predicated region fallthrough
CT: control target
= control target key end

     0   :  { %8 = vsyncpa [#allocation3], 0  ;;  %s1240_s0 = inlined_call_operand.hbm [shape: f32[2,1024], index: 0, kind: input, shape index: {}]   ;;  %s1241_s1 = inlined_call_operand.hbm [shape: f32[1,1024], index: 1, kind: input, shape index: {}]   ;;  %s1242_s2 = inlined_call_operand.hbm [shape: f32[1,1024], index: 2, kind: input, shape index: {}]   ;;  %s1243_s3 = inlined_call_operand.hbm [shape: f32[2,1024], index: 3, kind: output, shape index: {}]  }
   0x1   :  { %9 = vsyncpa [#allocation6], 0 }
   0x2   :  { %10 = vsyncpa [#allocation4], 0  ;;  %s727_s12 = smov [#allocation5]   ;;  %s728_s14 = smov [#allocation2]  }
   0x3   :  { %s27_s13 = sshll.u32 %s727_s12, 4  ;;  %s17_s15 = sshll.u32 %s728_s14, 4  ;;  %s28_s13 = int_to_ptr.vmem [resolvable:$true] %s27_s13  ;;  %s18_s15 = int_to_ptr.vmem [resolvable:$true] %s17_s15 }
   0x4   :  { %s633_s18 = scalar_lea.hbm %s1241_s1, 128 }
   0x5   :  { %p634_p0 = scmp.ne.s32.totalorder %s1241_s1, %s633_s18  ;;  %p637_p1 = scmp.lt.u32.totalorder %s633_s18, %s1241_s1 }
   0x7   :  { %p639_p2 = pnand %p637_p1, %p634_p0 }
   0x9   :  { %642 = shalt.err (!%p639_p2)
}
   0xa   :  { %s643_s23 = scalar_lea.vmem %s28_s13, 128  ;;  %p648_p4 = scmp.lt.s32.totalorder %s28_s13, %s28_s13 }
   0xb   :  { %p644_p3 = scmp.ne.s32.totalorder %s28_s13, %s643_s23  ;;  %p649_p5 = scmp.lt.s32.totalorder %s643_s23, %s643_s23 }
   0xd   :  { %p650_p6 = por %p649_p5, %p648_p4 }
   0xf   :  { %p651_p7 = pnand %p650_p6, %p644_p3 }
  0x11   :  { %654 = shalt.err (!%p651_p7)
}
  0x12   :  { %30 = dma.hbm_to_vmem [thread:$0]  %s1241_s1, 128, %s28_s13, [#allocation6]  }
  0x13   :  { %s655_s28 = scalar_lea.hbm %s1240_s0, 256 }
  0x14   :  { %p656_p8 = scmp.ne.s32.totalorder %s1240_s0, %s655_s28  ;;  %p659_p9 = scmp.lt.u32.totalorder %s655_s28, %s1240_s0 }
  0x16   :  { %p661_p10 = pnand %p659_p9, %p656_p8 }
  0x18   :  { %664 = shalt.err (!%p661_p10)
}
  0x19   :  { %s665_s6 = scalar_lea.vmem %s18_s15, 256  ;;  %p670_p12 = scmp.lt.s32.totalorder %s18_s15, %s18_s15 }
  0x1a   :  { %p666_p11 = scmp.ne.s32.totalorder %s18_s15, %s665_s6  ;;  %p671_p13 = scmp.lt.s32.totalorder %s665_s6, %s665_s6 }
  0x1c   :  { %p672_p0 = por %p671_p13, %p670_p12 }
  0x1e   :  { %p673_p1 = pnand %p672_p0, %p666_p11 }
  0x20   :  { %676 = shalt.err (!%p673_p1)
}
  0x21   :  { %20 = dma.hbm_to_vmem [thread:$0]  %s1240_s0, 256, %s18_s15, [#allocation3]  }
  0x22   :  { %s729_s8 = smov [#allocation7]   ;;  %s677_s12 = scalar_lea.hbm %s1242_s2, 128 }
  0x23   :  { %s37_s9 = sshll.u32 %s729_s8, 4  ;;  %p678_p2 = scmp.ne.s32.totalorder %s1242_s2, %s677_s12  ;;  %s38_s9 = int_to_ptr.vmem [resolvable:$true] %s37_s9 }
  0x24   :  { %p681_p3 = scmp.lt.u32.totalorder %s677_s12, %s1242_s2 }
  0x26   :  { %p683_p4 = pnand %p681_p3, %p678_p2 }
  0x28   :  { %686 = shalt.err (!%p683_p4)
}
  0x29   :  { %s687_s18 = scalar_lea.vmem %s38_s9, 128  ;;  %p692_p6 = scmp.lt.s32.totalorder %s38_s9, %s38_s9 }
  0x2a   :  { %p688_p5 = scmp.ne.s32.totalorder %s38_s9, %s687_s18  ;;  %p693_p7 = scmp.lt.s32.totalorder %s687_s18, %s687_s18 }
  0x2c   :  { %p694_p8 = por %p693_p7, %p692_p6 }
  0x2e   :  { %p695_p9 = pnand %p694_p8, %p688_p5 }
  0x30   :  { %698 = shalt.err (!%p695_p9)
}
  0x31   :  { %40 = dma.hbm_to_vmem [thread:$0]  %s1242_s2, 128, %s38_s9, [#allocation6]  }
  0x32   :  { %721 = dma.done.wait [#allocation3], 256  }
  0x33   :  { %722 = vsyncadd [#allocation3], 4294967040 }
  0x34   :  { %723 = dma.done.wait [#allocation6], 256  }
  0x35   :  { %724 = vsyncadd [#allocation6], 4294967040  ;;  %v55_v0 = vlaneseq  ;;  %v730_v1 = vmov 1983009808   ;;  %v50_v8 = vld [vmem:[#allocation2] sm:$0xff]  ;;  %v51_v9 = vld [vmem:[#allocation2 + $0x8] sm:$0xff] }
  0x36   :  { %v99_v2 = vunpack.c.l.s4 %v730_v1  ;;  %v53_v14 = vld [vmem:[#allocation7] sm:$0xff]  ;;  %v97_v15 = vcombine.high %v50_v8, %v50_v8  ;;  %v114_v17 = vcombine.high %v51_v9, %v51_v9  ;;  %s731_s2 = smov [#allocation8]  }
  0x37   :  { %v788_v3 = vshrl.u32 %v55_v0, 7  ;;  %s552_s19 = sshll.u32 %s731_s2, 4  ;;  %s553_s19 = int_to_ptr.vmem [resolvable:$true] %s552_s19 }
  0x38   :  { %v100_v4 = vunpack.c.0.s8 %v99_v2  ;;  %s699_s20 = scalar_lea.vmem %s553_s19, 256  ;;  %p704_p11 = scmp.lt.s32.totalorder %s553_s19, %s553_s19 }
  0x39   :  { %v57_v5 = vsub.s32 0, %v788_v3  ;;  %v61_v6 = vsub.s32 1, %v788_v3  ;;  %v65_v10 = vsub.s32 2, %v788_v3  ;;  %v69_v11 = vsub.s32 3, %v788_v3  ;;  %p700_p10 = scmp.ne.s32.totalorder %s553_s19, %s699_s20  ;;  %p705_p12 = scmp.lt.s32.totalorder %s699_s20, %s699_s20 }
  0x3a   :  { %v793_v7 = vsub.s32 %v100_v4, %v788_v3  ;;  %v73_v12 = vsub.s32 4, %v788_v3  ;;  %v77_v13 = vsub.s32 5, %v788_v3  ;;  %v81_v19 = vsub.s32 6, %v788_v3  ;;  %v869_v4 = vld [vmem:[#allocation5] sm:$0xff] }
  0x3b   :  { %v804_v20 = vrot.slane %v53_v14, %v57_v5  ;;  %v808_v21 = vrot.slane %v53_v14, %v61_v6  ;;  %v1244_v22 = vsub.s32 7, %v788_v3  ;;  %v813_v23 = vrot.slane %v53_v14, %v65_v10  ;;  %p706_p13 = por %p705_p12, %p704_p11 }
  0x3c   :  { %v104_v16 = vrot.slane %v50_v8, %v793_v7  ;;  %v121_v18 = vrot.slane %v51_v9, %v793_v7  ;;  %v111_v24 = vrot.slane %v97_v15, %v793_v7  ;;  %v128_v26 = vrot.slane %v114_v17, %v793_v7 }
  0x3d   :  { %v819_v27 = vrot.slane %v53_v14, %v69_v11  ;;  %v823_v28 = vrot.slane %v53_v14, %v73_v12  ;;  %v827_v29 = vrot.slane %v53_v14, %v77_v13  ;;  %v831_v31 = vrot.slane %v53_v14, %v81_v19  ;;  %p707_p0 = pnand %p706_p13, %p700_p10 }
  0x3e   :  { %v112_v25 = vcombine.high %v104_v16, %v104_v16  ;;  %v129_v30 = vcombine.high %v121_v18, %v121_v18  ;;  %v113_v32 = vcombine.high %v111_v24, %v111_v24  ;;  %v835_v33 = vrot.slane %v53_v14, %v1244_v22 }
  0x3f   :  { %v130_v34 = vcombine.high %v128_v26, %v128_v26  ;;  %v838_v35 = vsub.f32 %v804_v20, %v104_v16  ;;  %v844_v37 = vsub.f32 %v813_v23, %v111_v24  ;;  %v850_v39 = vsub.f32 %v823_v28, %v121_v18 }
  0x40   :  { %v841_v36 = vsub.f32 %v808_v21, %v112_v25  ;;  %v847_v38 = vsub.f32 %v819_v27, %v113_v32  ;;  %v853_v40 = vsub.f32 %v827_v29, %v129_v30  ;;  %v856_v41 = vsub.f32 %v831_v31, %v128_v26 }
  0x41   :  { %v859_v42 = vsub.f32 %v835_v33, %v130_v34  ;;  %v171_v43 = vand.u32 2147483647, %v838_v35  ;;  %v173_v45 = vand.u32 2147483647, %v844_v37  ;;  %v175_v47 = vand.u32 2147483647, %v850_v39 }
  0x42   :  { %v172_v44 = vand.u32 2147483647, %v841_v36  ;;  %v174_v46 = vand.u32 2147483647, %v847_v38  ;;  %v176_v48 = vand.u32 2147483647, %v853_v40  ;;  %v874_v15 = vrot.slane %v869_v4, %v57_v5 }
  0x43   :  { %v177_v49 = vand.u32 2147483647, %v856_v41  ;;  %v179_v50 = vsub.f32 0.0, %v171_v43  ;;  %v178_v52 = vand.u32 2147483647, %v859_v42  ;;  %v181_v53 = vsub.f32 0.0, %v173_v45 }
  0x44   :  { %v180_v51 = vsub.f32 0.0, %v172_v44  ;;  %v182_v54 = vsub.f32 0.0, %v174_v46  ;;  %v183_v55 = vsub.f32 0.0, %v175_v47  ;;  %v184_v56 = vsub.f32 0.0, %v176_v48 }
  0x45   :  { %v187_v57 = vmul.f32 1.442695, %v179_v50  ;;  %v185_v59 = vsub.f32 0.0, %v177_v49  ;;  %v191_v60 = vmul.f32 1.442695, %v181_v53  ;;  %v186_v63 = vsub.f32 0.0, %v178_v52 }
  0x46   :  { %v189_v58 = vmul.f32 1.442695, %v180_v51  ;;  %v193_v61 = vmul.f32 1.442695, %v182_v54  ;;  %v195_v62 = vmul.f32 1.442695, %v183_v55  ;;  %v879_v16 = vrot.slane %v869_v4, %v61_v6 }
  0x47   :  { %569 = vpow2.f32 %v187_v57  ;;  %v197_v0 = vmul.f32 1.442695, %v184_v56  ;;  %v199_v1 = vmul.f32 1.442695, %v185_v59  ;;  %v201_v2 = vmul.f32 1.442695, %v186_v63 }
  0x48   :  { %571 = vpow2.f32 %v189_v58  ;;  %v147_v18 = vmax.f32 %v838_v35, 0.0  ;;  %v148_v24 = vmax.f32 %v841_v36, 0.0  ;;  %v151_v25 = vmax.f32 %v850_v39, 0.0 }
  0x49   :  { %573 = vpow2.f32 %v191_v60  ;;  %v149_v32 = vmax.f32 %v844_v37, 0.0  ;;  %v152_v44 = vmax.f32 %v853_v40, 0.0  ;;  %v153_v46 = vmax.f32 %v856_v41, 0.0 }
  0x4a   :  { %575 = vpow2.f32 %v193_v61  ;;  %v150_v50 = vmax.f32 %v847_v38, 0.0  ;;  %v154_v51 = vmax.f32 %v859_v42, 0.0  ;;  %v896_v53 = vrot.slane %v869_v4, %v65_v10 }
  0x4b   :  { %577 = vpow2.f32 %v195_v62  ;;  %vm155_vm0 = vcmp.ne.f32.partialorder %v838_v35, %v838_v35  ;;  %v911_v10 = vrot.slane %v869_v4, %v69_v11  ;;  %vm156_vm2 = vcmp.ne.f32.partialorder %v841_v36, %v841_v36 }
  0x4c   :  { %579 = vpow2.f32 %v197_v0  ;;  %vm157_vm3 = vcmp.ne.f32.partialorder %v844_v37, %v844_v37  ;;  %vm158_vm5 = vcmp.ne.f32.partialorder %v847_v38, %v847_v38  ;;  %vm159_vm7 = vcmp.ne.f32.partialorder %v850_v39, %v850_v39 }
  0x4d   :  { %581 = vpow2.f32 %v199_v1  ;;  %vm160_vm9 = vcmp.ne.f32.partialorder %v853_v40, %v853_v40  ;;  %vm161_vm11 = vcmp.ne.f32.partialorder %v856_v41, %v856_v41  ;;  %vm162_vm12 = vcmp.ne.f32.partialorder %v859_v42, %v859_v42 }
  0x4e   :  { %583 = vpow2.f32 %v201_v2 }
  0x51   :  { %v570_v8 = vpop.eup %569 }
  0x52   :  { %v572_v9 = vpop.eup %571  ;;  %v203_v14 = vadd.f32 1.0, %v570_v8  ;;  %v206_v34 = vmul.f32 -0.5, %v570_v8  ;;  %v209_v6 = vand.u32 2147483647, %v570_v8 }
  0x53   :  { %v574_v17 = vpop.eup %573  ;;  %v212_v26 = vadd.f32 1.0, %v572_v9  ;;  %v215_v45 = vmul.f32 -0.5, %v572_v9  ;;  %v218_v52 = vand.u32 2147483647, %v572_v9 }
  0x54   :  { %v576_v30 = vpop.eup %575  ;;  %585 = vlog2.f32 %v203_v14  ;;  %v221_v5 = vadd.f32 1.0, %v574_v17  ;;  %v224_v47 = vmul.f32 -0.5, %v574_v17  ;;  %v207_v55 = vadd.f32 1.0, %v206_v34 }
  0x55   :  { %v885_v43 = vpop.eup %577  ;;  %587 = vlog2.f32 %v212_v26  ;;  %v230_v48 = vadd.f32 1.0, %v576_v30  ;;  %v233_v56 = vmul.f32 -0.5, %v576_v30  ;;  %vm903_vm1 = vcmp.lt.f32.partialorder %v209_v6, 0.0004427343 }
  0x56   :  { %589 = vlog2.f32 %v221_v5  ;;  %v889_v49 = vpop.eup %579  ;;  %v239_v57 = vadd.f32 1.0, %v885_v43  ;;  %v216_v59 = vadd.f32 1.0, %v215_v45  ;;  %v242_v60 = vmul.f32 -0.5, %v885_v43 }
  0x57   :  { %v898_v54 = vpop.eup %581  ;;  %591 = vlog2.f32 %v230_v48  ;;  %v225_v62 = vadd.f32 1.0, %v224_v47  ;;  %v227_v63 = vand.u32 2147483647, %v574_v17  ;;  %v248_v0 = vadd.f32 1.0, %v889_v49 }
  0x58   :  { %v913_v61 = vpop.eup %583  ;;  %593 = vlog2.f32 %v239_v57  ;;  %vm920_vm4 = vcmp.lt.f32.partialorder %v218_v52, 0.0004427343  ;;  %v236_v2 = vand.u32 2147483647, %v576_v30  ;;  %v257_v11 = vadd.f32 1.0, %v898_v54 }
  0x59   :  { %v928_v14 = vrot.slane %v869_v4, %v73_v12  ;;  %v208_v26 = vmul.f32 %v570_v8, %v207_v55  ;;  %v234_v34 = vadd.f32 1.0, %v233_v56  ;;  %595 = vlog2.f32 %v248_v0 }
  0x5a   :  { %v251_v5 = vmul.f32 -0.5, %v889_v49  ;;  %v243_v6 = vadd.f32 1.0, %v242_v60  ;;  %v245_v45 = vand.u32 2147483647, %v885_v43  ;;  %597 = vlog2.f32 %v257_v11 }
  0x5b   :  { %v266_v47 = vadd.f32 1.0, %v913_v61  ;;  %v217_v52 = vmul.f32 %v572_v9, %v216_v59  ;;  %v226_v57 = vmul.f32 %v574_v17, %v225_v62  ;;  %vm935_vm6 = vcmp.lt.f32.partialorder %v227_v63, 0.0004427343 }
  0x5c   :  { %v260_v8 = vmul.f32 -0.5, %v898_v54  ;;  %vm942_vm8 = vcmp.lt.f32.partialorder %v236_v2, 0.0004427343  ;;  %v269_v0 = vmul.f32 -0.5, %v913_v61  ;;  %v235_v59 = vmul.f32 %v576_v30, %v234_v34 }
  0x5d   :  { %599 = vlog2.f32 %v266_v47  ;;  %v252_v62 = vadd.f32 1.0, %v251_v5  ;;  %v254_v63 = vand.u32 2147483647, %v889_v49  ;;  %v244_v2 = vmul.f32 %v885_v43, %v243_v6 }
  0x5e   :  { %v586_v48 = vpop.eup %585  ;;  %vm953_vm10 = vcmp.lt.f32.partialorder %v245_v45, 0.0004427343  ;;  %v261_v34 = vadd.f32 1.0, %v260_v8  ;;  %v263_v5 = vand.u32 2147483647, %v898_v54  ;;  %v270_v6 = vadd.f32 1.0, %v269_v0 }
  0x5f   :  { %v588_v55 = vpop.eup %587  ;;  %v205_v56 = vmul.f32 0.6931472, %v586_v48  ;;  %v253_v1 = vmul.f32 %v889_v49, %v252_v62  ;;  %vm971_vm13 = vcmp.lt.f32.partialorder %v254_v63, 0.0004427343  ;;  %v272_v8 = vand.u32 2147483647, %v913_v61 }
  0x60   :  { %v590_v9 = vpop.eup %589  ;;  %v214_v17 = vmul.f32 0.6931472, %v588_v55  ;;  %v262_v0 = vmul.f32 %v898_v54, %v261_v34  ;;  %vm989_vm14 = vcmp.lt.f32.partialorder %v263_v5, 0.0004427343  ;;  %v1259_v5 = vsub.s32 7, %v788_v3 }
  0x61   :  { %v211_v11 = vsel %vm903_vm1, %v208_v26, %v205_v56  ;;  %v223_v48 = vmul.f32 0.6931472, %v590_v9  ;;  %v592_v47 = vpop.eup %591  ;;  %vm273_vm15 = vcmp.lt.f32.partialorder %v272_v8, 0.0004427343 }
  0x62   :  { %v220_v30 = vsel %vm920_vm4, %v217_v52, %v214_v17  ;;  %v275_v58 = vadd.f32 %v211_v11, %v147_v18  ;;  %v232_v26 = vmul.f32 0.6931472, %v592_v47  ;;  %v594_v55 = vpop.eup %593 }
  0x63   :  { %v229_v43 = vsel %vm935_vm6, %v226_v57, %v223_v48  ;;  %v276_v45 = vadd.f32 %v220_v30, %v148_v24  ;;  %v241_v12 = vmul.f32 0.6931472, %v594_v55  ;;  %v596_v56 = vpop.eup %595 }
  0x64   :  { %v277_v18 = vadd.f32 %v229_v43, %v149_v32  ;;  %v283_v57 = vsel %vm155_vm0, %v838_v35, %v275_v58  ;;  %v238_v24 = vsel %vm942_vm8, %v235_v59, %v232_v26  ;;  %v598_v9 = vpop.eup %597  ;;  %v271_v59 = vmul.f32 %v913_v61, %v270_v6 }
  0x65   :  { %v284_v49 = vsel %vm156_vm2, %v841_v36, %v276_v45  ;;  %v278_v35 = vadd.f32 %v238_v24, %v150_v50  ;;  %v247_v17 = vsel %vm953_vm10, %v244_v2, %v241_v12  ;;  %v250_v36 = vmul.f32 0.6931472, %v596_v56 }
  0x66   :  { %v285_v60 = vsel %vm157_vm3, %v844_v37, %v277_v18  ;;  %v291_v54 = vsub.f32 %v804_v20, %v283_v57  ;;  %v259_v62 = vmul.f32 0.6931472, %v598_v9  ;;  %v279_v63 = vadd.f32 %v247_v17, %v151_v25 }
  0x67   :  { %v286_v50 = vsel %vm158_vm5, %v847_v38, %v278_v35  ;;  %v292_v37 = vsub.f32 %v808_v21, %v284_v49  ;;  %v600_v11 = vpop.eup %599  ;;  %v256_v22 = vsel %vm971_vm13, %v253_v1, %v250_v36  ;;  %v293_v61 = vsub.f32 %v813_v23, %v285_v60 }
  0x68   :  { %v294_v20 = vsub.f32 %v819_v27, %v286_v50  ;;  %v265_v48 = vsel %vm989_vm14, %v262_v0, %v259_v62  ;;  %v268_v25 = vmul.f32 0.6931472, %v600_v11  ;;  %v280_v2 = vadd.f32 %v256_v22, %v152_v44 }
  0x69   :  { %v287_v21 = vsel %vm159_vm7, %v850_v39, %v279_v63  ;;  %v281_v38 = vadd.f32 %v265_v48, %v153_v46  ;;  %v1028_v23 = vrot.slane %v869_v4, %v77_v13  ;;  %v1033_v27 = vrot.slane %v869_v4, %v81_v19 }
  0x6a   :  { %v295_v47 = vsub.f32 %v823_v28, %v287_v21  ;;  %v274_v44 = vsel %vm273_vm15, %v271_v59, %v268_v25  ;;  %v288_v39 = vsel %vm160_vm9, %v853_v40, %v280_v2  ;;  %v1040_v46 = vsub.f32 %v291_v54, %v874_v15 }
  0x6b   :  { %v1043_v28 = vsub.f32 %v292_v37, %v879_v16  ;;  %v282_v13 = vadd.f32 %v274_v44, %v154_v51  ;;  %v289_v19 = vsel %vm161_vm11, %v856_v41, %v281_v38  ;;  %v296_v30 = vsub.f32 %v827_v29, %v288_v39 }
  0x6c   :  { %v1053_v34 = vsub.f32 %v293_v61, %v896_v53  ;;  %v297_v40 = vsub.f32 %v831_v31, %v289_v19  ;;  %v1059_v58 = vrot.slane %v869_v4, %v1259_v5  ;;  %v1062_v43 = vsub.f32 %v294_v20, %v911_v10 }
  0x6d   :  { %v290_v41 = vsel %vm162_vm12, %v859_v42, %v282_v13  ;;  %v1069_v29 = vsub.f32 %v295_v47, %v928_v14  ;;  %v1072_v51 = vsub.f32 %v296_v30, %v1028_v23  ;;  %v372_v4 = vand.u32 2147483647, %v1040_v46 }
  0x6e   :  { %v298_v31 = vsub.f32 %v835_v33, %v290_v41  ;;  %v1076_v3 = vsub.f32 %v297_v40, %v1033_v27  ;;  %v373_v26 = vand.u32 2147483647, %v1043_v28  ;;  %v374_v6 = vand.u32 2147483647, %v1053_v34 }
  0x6f   :  { %v375_v42 = vand.u32 2147483647, %v1062_v43  ;;  %v376_v55 = vand.u32 2147483647, %v1069_v29  ;;  %v377_v1 = vand.u32 2147483647, %v1072_v51  ;;  %vm356_vm0 = vcmp.ne.f32.partialorder %v1040_v46, %v1040_v46 }
  0x70   :  { %v1082_v45 = vsub.f32 %v298_v31, %v1059_v58  ;;  %v378_v33 = vand.u32 2147483647, %v1076_v3  ;;  %v380_v18 = vsub.f32 0.0, %v372_v4  ;;  %v381_v57 = vsub.f32 0.0, %v373_v26 }
  0x71   :  { %v382_v24 = vsub.f32 0.0, %v374_v6  ;;  %v383_v12 = vsub.f32 0.0, %v375_v42  ;;  %v384_v8 = vsub.f32 0.0, %v376_v55  ;;  %v385_v49 = vsub.f32 0.0, %v377_v1 }
  0x72   :  { %v379_v52 = vand.u32 2147483647, %v1082_v45  ;;  %v386_v56 = vsub.f32 0.0, %v378_v33  ;;  %v388_v0 = vmul.f32 1.442695, %v380_v18  ;;  %v348_v20 = vmax.f32 %v1040_v46, 0.0 }
  0x73   :  { %v390_v32 = vmul.f32 1.442695, %v381_v57  ;;  %v392_v35 = vmul.f32 1.442695, %v382_v24  ;;  %v394_v60 = vmul.f32 1.442695, %v383_v12  ;;  %vm357_vm2 = vcmp.ne.f32.partialorder %v1043_v28, %v1043_v28 }
  0x74   :  { %601 = vpow2.f32 %v388_v0  ;;  %v396_v9 = vmul.f32 1.442695, %v384_v8  ;;  %v387_v17 = vsub.f32 0.0, %v379_v52  ;;  %v398_v36 = vmul.f32 1.442695, %v385_v49 }
  0x75   :  { %603 = vpow2.f32 %v390_v32  ;;  %v400_v59 = vmul.f32 1.442695, %v386_v56  ;;  %v349_v21 = vmax.f32 %v1043_v28, 0.0  ;;  %v350_v38 = vmax.f32 %v1053_v34, 0.0 }
  0x76   :  { %605 = vpow2.f32 %v392_v35  ;;  %v402_v54 = vmul.f32 1.442695, %v387_v17  ;;  %v351_v44 = vmax.f32 %v1062_v43, 0.0  ;;  %v352_v30 = vmax.f32 %v1069_v29, 0.0 }
  0x77   :  { %607 = vpow2.f32 %v394_v60  ;;  %v353_v40 = vmax.f32 %v1072_v51, 0.0  ;;  %v354_v42 = vmax.f32 %v1076_v3, 0.0  ;;  %vm358_vm3 = vcmp.ne.f32.partialorder %v1053_v34, %v1053_v34 }
  0x78   :  { %609 = vpow2.f32 %v396_v9  ;;  %vm359_vm5 = vcmp.ne.f32.partialorder %v1062_v43, %v1062_v43  ;;  %vm360_vm7 = vcmp.ne.f32.partialorder %v1069_v29, %v1069_v29  ;;  %vm361_vm10 = vcmp.ne.f32.partialorder %v1072_v51, %v1072_v51 }
  0x79   :  { %611 = vpow2.f32 %v398_v36  ;;  %vm362_vm12 = vcmp.ne.f32.partialorder %v1076_v3, %v1076_v3  ;;  %vm363_vm15 = vcmp.ne.f32.partialorder %v1082_v45, %v1082_v45 }
  0x7a   :  { %613 = vpow2.f32 %v400_v59 }
  0x7b   :  { %615 = vpow2.f32 %v402_v54 }
  0x7e   :  { %v602_v62 = vpop.eup %601 }
  0x7f   :  { %v604_v63 = vpop.eup %603  ;;  %v404_v50 = vadd.f32 1.0, %v602_v62  ;;  %v407_v11 = vmul.f32 -0.5, %v602_v62  ;;  %v410_v47 = vand.u32 2147483647, %v602_v62 }
  0x80   :  { %v606_v37 = vpop.eup %605  ;;  %v413_v22 = vadd.f32 1.0, %v604_v63  ;;  %v416_v48 = vmul.f32 -0.5, %v604_v63  ;;  %v419_v41 = vand.u32 2147483647, %v604_v63 }
  0x81   :  { %v608_v61 = vpop.eup %607  ;;  %617 = vlog2.f32 %v404_v50  ;;  %v422_v25 = vadd.f32 1.0, %v606_v37  ;;  %v425_v39 = vmul.f32 -0.5, %v606_v37  ;;  %v408_v5 = vadd.f32 1.0, %v407_v11 }
  0x82   :  { %v1090_v2 = vpop.eup %609  ;;  %619 = vlog2.f32 %v413_v22  ;;  %v431_v13 = vadd.f32 1.0, %v608_v61  ;;  %v417_v4 = vadd.f32 1.0, %v416_v48  ;;  %v434_v26 = vmul.f32 -0.5, %v608_v61 }
  0x83   :  { %621 = vlog2.f32 %v422_v25  ;;  %v612_v19 = vpop.eup %611  ;;  %v440_v6 = vadd.f32 1.0, %v1090_v2  ;;  %vm1103_vm1 = vcmp.lt.f32.partialorder %v410_v47, 0.0004427343  ;;  %v428_v1 = vand.u32 2147483647, %v606_v37 }
  0x84   :  { %v1097_v31 = vpop.eup %613  ;;  %623 = vlog2.f32 %v431_v13  ;;  %v443_v33 = vmul.f32 -0.5, %v1090_v2  ;;  %v426_v18 = vadd.f32 1.0, %v425_v39  ;;  %v449_v57 = vadd.f32 1.0, %v612_v19 }
  0x85   :  { %v1108_v52 = vpop.eup %615  ;;  %625 = vlog2.f32 %v440_v6  ;;  %v452_v24 = vmul.f32 -0.5, %v612_v19  ;;  %v409_v12 = vmul.f32 %v602_v62, %v408_v5  ;;  %vm1114_vm4 = vcmp.lt.f32.partialorder %v419_v41, 0.0004427343 }
  0x86   :  { %v437_v49 = vand.u32 2147483647, %v608_v61  ;;  %v458_v56 = vadd.f32 1.0, %v1097_v31  ;;  %v418_v0 = vmul.f32 %v604_v63, %v417_v4  ;;  %v435_v32 = vadd.f32 1.0, %v434_v26 }
  0x87   :  { %v446_v35 = vand.u32 2147483647, %v1090_v2  ;;  %627 = vlog2.f32 %v449_v57  ;;  %v444_v60 = vadd.f32 1.0, %v443_v33  ;;  %v455_v9 = vand.u32 2147483647, %v612_v19 }
  0x88   :  { %629 = vlog2.f32 %v458_v56  ;;  %v467_v17 = vadd.f32 1.0, %v1108_v52  ;;  %v427_v59 = vmul.f32 %v606_v37, %v426_v18  ;;  %vm1123_vm6 = vcmp.lt.f32.partialorder %v428_v1, 0.0004427343 }
  0x89   :  { %v453_v62 = vadd.f32 1.0, %v452_v24  ;;  %v461_v63 = vmul.f32 -0.5, %v1097_v31  ;;  %vm1130_vm8 = vcmp.lt.f32.partialorder %v437_v49, 0.0004427343  ;;  %v470_v48 = vmul.f32 -0.5, %v1108_v52 }
  0x8a   :  { %631 = vlog2.f32 %v467_v17  ;;  %v436_v47 = vmul.f32 %v608_v61, %v435_v32  ;;  %vm1135_vm9 = vcmp.lt.f32.partialorder %v446_v35, 0.0004427343  ;;  %v464_v13 = vand.u32 2147483647, %v1097_v31 }
  0x8b   :  { %v618_v36 = vpop.eup %617  ;;  %v445_v4 = vmul.f32 %v1090_v2, %v444_v60  ;;  %vm1145_vm11 = vcmp.lt.f32.partialorder %v455_v9, 0.0004427343  ;;  %v454_v1 = vmul.f32 %v612_v19, %v453_v62  ;;  %v462_v33 = vadd.f32 1.0, %v461_v63 }
  0x8c   :  { %v620_v50 = vpop.eup %619  ;;  %v406_v11 = vmul.f32 0.6931472, %v618_v36  ;;  %v471_v57 = vadd.f32 1.0, %v470_v48  ;;  %vm1159_vm13 = vcmp.lt.f32.partialorder %v464_v13, 0.0004427343  ;;  %v355_v62 = vmax.f32 %v1082_v45, 0.0 }
  0x8d   :  { %v622_v37 = vpop.eup %621  ;;  %v415_v25 = vmul.f32 0.6931472, %v620_v50  ;;  %v473_v8 = vand.u32 2147483647, %v1108_v52  ;;  %v463_v60 = vmul.f32 %v1097_v31, %v462_v33 }
  0x8e   :  { %v412_v5 = vsel %vm1103_vm1, %v409_v12, %v406_v11  ;;  %v424_v41 = vmul.f32 0.6931472, %v622_v37  ;;  %v624_v61 = vpop.eup %623 }
  0x8f   :  { %v421_v6 = vsel %vm1114_vm4, %v418_v0, %v415_v25  ;;  %v476_v55 = vadd.f32 %v412_v5, %v348_v20  ;;  %v433_v2 = vmul.f32 0.6931472, %v624_v61  ;;  %v626_v12 = vpop.eup %625  ;;  %vm474_vm14 = vcmp.lt.f32.partialorder %v473_v8, 0.0004427343 }
  0x90   :  { %v430_v18 = vsel %vm1123_vm6, %v427_v59, %v424_v41  ;;  %v477_v24 = vadd.f32 %v421_v6, %v349_v21  ;;  %v442_v0 = vmul.f32 0.6931472, %v626_v12 }
  0x91   :  { %v478_v19 = vadd.f32 %v430_v18, %v350_v38  ;;  %v484_v20 = vsel %vm356_vm0, %v1040_v46, %v476_v55  ;;  %v439_v56 = vsel %vm1130_vm8, %v436_v47, %v433_v2  ;;  %v628_v35 = vpop.eup %627 }
  0x92   :  { %v485_v21 = vsel %vm357_vm2, %v1043_v28, %v477_v24  ;;  %v492_v32 = vadd.f32 %v484_v20, %v874_v15  ;;  %v479_v38 = vadd.f32 %v439_v56, %v351_v44  ;;  %v630_v17 = vpop.eup %629  ;;  %v448_v36 = vsel %vm1135_vm9, %v445_v4, %v442_v0 }
  0x93   :  { %v486_v46 = vsel %vm358_vm3, %v1053_v34, %v478_v19  ;;  %v493_v9 = vadd.f32 %v485_v21, %v879_v16  ;;  %v451_v28 = vmul.f32 0.6931472, %v628_v35  ;;  %v472_v15 = vmul.f32 %v1108_v52, %v471_v57 }
  0x94   :  { %v494_v59 = vadd.f32 %v486_v46, %v896_v53  ;;  %v460_v31 = vmul.f32 0.6931472, %v630_v17  ;;  %v480_v44 = vadd.f32 %v448_v36, %v352_v30  ;;  %v487_v34 = vsel %vm359_vm5, %v1062_v43, %v479_v38  ;;  %v632_v16 = vpop.eup %631 }
  0x95   :  { %v508_v54 = vcombine.low %v492_v32, %v493_v9  ;;  %v457_v63 = vsel %vm1145_vm11, %v454_v1, %v451_v28  ;;  %v495_v52 = vadd.f32 %v487_v34, %v911_v10  ;;  %v469_v50 = vmul.f32 0.6931472, %v632_v16 }
  0x96   :  { %v466_v53 = vsel %vm1159_vm13, %v463_v60, %v460_v31  ;;  %v481_v30 = vadd.f32 %v457_v63, %v353_v40  ;;  %v488_v43 = vsel %vm360_vm7, %v1069_v29, %v480_v44 }
  0x97   :  { %v482_v11 = vadd.f32 %v466_v53, %v354_v42  ;;  %v496_v22 = vadd.f32 %v488_v43, %v928_v14  ;;  %v509_v48 = vcombine.low %v494_v59, %v495_v52  ;;  %v516_v10 = vrot.slane %v508_v54, %v793_v7 }
  0x98   :  { %v475_v37 = vsel %vm474_vm14, %v472_v15, %v469_v50  ;;  %v489_v40 = vsel %vm361_vm10, %v1072_v51, %v481_v30 }
  0x99   :  { %v483_v25 = vadd.f32 %v475_v37, %v355_v62  ;;  %v490_v29 = vsel %vm362_vm12, %v1076_v3, %v482_v11  ;;  %v497_v14 = vadd.f32 %v489_v40, %v1028_v23  ;;  %v523_v42 = vrot.slane %v509_v48, %v793_v7 }
  0x9a   :  { %v498_v47 = vadd.f32 %v490_v29, %v1033_v27 }
  0x9b   :  { %v491_v39 = vsel %vm363_vm15, %v1082_v45, %v483_v25  ;;  %v524_v13 = vcombine.low %v516_v10, %v523_v42  ;;  %v525_v5 = vcombine.low %v496_v22, %v497_v14 }
  0x9c   :  { %v499_v41 = vadd.f32 %v491_v39, %v1059_v58 }
  0x9d   :  { %544 = vst [vmem:[#allocation8] sm:$0xff] %v524_v13  ;;  %v533_v4 = vrot.slane %v525_v5, %v793_v7 }
  0x9e   :  { %v526_v51 = vcombine.low %v498_v47, %v499_v41 }
  0xa0   :  { %v540_v3 = vrot.slane %v526_v51, %v793_v7 }
  0xa2   :  { %v541_v26 = vcombine.low %v533_v4, %v540_v3 }
  0xa4   :  { %545 = vst [vmem:[#allocation8 + $0x8] sm:$0xff] %v541_v26 }
  0xa5   :  { %710 = shalt.err (!%p707_p0)
}
  0xa6   :  { %s711_s23 = scalar_lea.hbm %s1243_s3, 256 }
  0xa7   :  { %p712_p1 = scmp.ne.s32.totalorder %s1243_s3, %s711_s23  ;;  %p715_p2 = scmp.lt.u32.totalorder %s711_s23, %s1243_s3 }
  0xa9   :  { %p717_p3 = pnand %p715_p2, %p712_p1 }
  0xab   :  { %720 = shalt.err (!%p717_p3)
}
  0xac   :  { %555 = dma.vmem_to_hbm [thread:$0]  %s553_s19, 256, %s1243_s3, [#allocation4]  }
  0xad   :  { %725 = dma.done.wait [#allocation4], 256  }
  0xae   :  { %726 = vsyncadd [#allocation4], 4294967040 }
  0xaf   :  { %559 = vsyncpa [#allocation3], 1 }
  0xb0   :  { %560 = vsyncpa [#allocation6], 1 }
  0xb1   :  { %561 = vsyncpa [#allocation4], 1 }

</bundles_post_ra>
